<compile_context>
chip_gen: v7x
topology: tpu7x:2x2x1
jax: 0.10.0
libtpu: 0.0.40
codegen_flags: <defaults>
</compile_context>

<pallas_src>
import functools

import jax
import jax.numpy as jnp
from jax import lax
from jax.experimental import pallas as pl
from jax.experimental.pallas import tpu as pltpu


def _round_up(x, m):
    return (x + m - 1) // m * m


# --------------------------------- kernel ------------------------------------

def _patch_embed_kernel(p_ref, w_ref, b_ref, o_ref):
    # p_ref: (TILE_M, K) patch block; w_ref: (K, E); b_ref: (1, E); o_ref: (TILE_M, E)
    acc = jnp.dot(p_ref[...], w_ref[...], preferred_element_type=jnp.float32)
    o_ref[...] = (acc + b_ref[...]).astype(o_ref.dtype)


# --------------------------------- wrapper -----------------------------------

@functools.partial(jax.jit, static_argnames=("patch_size",))
def patch_embedding(x, conv_w, conv_b, *, patch_size=16):
    """x: (B, C, H, W); conv_w: (E, C, k, k); conv_b: (E,). Returns (B, P, E)."""
    B, C, H, W = x.shape
    E = conv_w.shape[0]
    k = patch_size
    Hp, Wp = H // k, W // k
    P = Hp * Wp
    K = C * k * k
    M = B * P

    # im2col: stride == kernel so this is a pure permutation (single XLA transpose,
    # each input element touched exactly once).  Flatten order (C, kh, kw) matches
    # the Conv2d weight flatten order.
    patches = x.reshape(B, C, Hp, k, Wp, k)
    patches = patches.transpose(0, 2, 4, 1, 3, 5).reshape(M, K)

    w_flat = conv_w.reshape(E, K).T            # (K, E), laid out for patches @ W
    b_flat = conv_b.reshape(1, E)

    # Coarse M-tiling: big blocks (multiple of 8 sublanes), pad M up to a multiple.
    tile_m = min(2048, _round_up(M, 8))
    m_pad = _round_up(M, tile_m)
    if m_pad != M:
        patches = jnp.pad(patches, ((0, m_pad - M), (0, 0)))

    out = pl.pallas_call(
        _patch_embed_kernel,
        out_shape=jax.ShapeDtypeStruct((m_pad, E), x.dtype),
        grid=(m_pad // tile_m,),
        in_specs=[
            pl.BlockSpec((tile_m, K), lambda i: (i, 0)),   # patch block
            pl.BlockSpec((K, E), lambda i: (0, 0)),        # flattened conv weight
            pl.BlockSpec((1, E), lambda i: (0, 0)),        # bias
        ],
        out_specs=pl.BlockSpec((tile_m, E), lambda i: (i, 0)),
        compiler_params=pltpu.CompilerParams(
            dimension_semantics=("parallel",)),
        cost_estimate=pl.CostEstimate(
            flops=2 * m_pad * K * E,
            transcendentals=0,
            bytes_accessed=4 * (m_pad * K + K * E + E + m_pad * E)),
    )(patches, w_flat, b_flat)

    return out[:M].reshape(B, P, E)


# ------------------------------ pure-JAX reference ---------------------------

def reference(x, conv_w, conv_b, patch_size):
    k = patch_size
    out = lax.conv_general_dilated(
        x, conv_w, window_strides=(k, k), padding="VALID",
        dimension_numbers=("NCHW", "OIHW", "NCHW"))
    out = out + conv_b.reshape(1, -1, 1, 1)
    B, E, Hp, Wp = out.shape
    # .flatten(2).transpose(1, 2)
    return out.reshape(B, E, Hp * Wp).transpose(0, 2, 1)


# ----------------------------------- main -------------------------------------

if __name__ == "__main__":
    key = jax.random.PRNGKey(0)
    kx, kw, kb = jax.random.split(key, 3)

    B, C, H, W = 2, 1, 32, 32          # 2x2 = 4 patches per image
    PATCH, EMB = 16, 64

    x = jax.random.normal(kx, (B, C, H, W), jnp.float32)
    conv_w = 0.05 * jax.random.normal(kw, (EMB, C, PATCH, PATCH), jnp.float32)
    conv_b = 0.05 * jax.random.normal(kb, (EMB,), jnp.float32)

    y = patch_embedding(x, conv_w, conv_b, patch_size=PATCH)
    y = jax.block_until_ready(y)

    y_ref = reference(x, conv_w, conv_b, PATCH)
    assert y.shape == (B, (H // PATCH) * (W // PATCH), EMB)
    assert jnp.allclose(y, y_ref, atol=1e-2, rtol=1e-2), "mismatch vs conv reference"

    print("KERNEL_OK")
</pallas_src>

<mosaic_0001>
module attributes {stable_mosaic.version = 11 : i64} {
  func.func @_patch_embed_kernel(%arg0: i32, %arg1: memref<8x256xf32, #tpu.memory_space<vmem>>, %arg2: memref<256x64xf32, #tpu.memory_space<vmem>>, %arg3: memref<1x64xf32, #tpu.memory_space<vmem>>, %arg4: memref<8x64xf32, #tpu.memory_space<vmem>>) attributes {dimension_semantics = [#tpu.dimension_semantics<parallel>], iteration_bounds = array<i64: 1>, scalar_prefetch = 0 : i64, scratch_operands = 0 : i64, tpu.core_type = #tpu.core_type<tc>, window_params = [{transform_indices = @transform_0, window_bounds = array<i64: 8, 256>}, {pipeline_mode = #tpu.pipeline_mode<synchronous>, transform_indices = @transform_1, window_bounds = array<i64: 256, 64>}, {pipeline_mode = #tpu.pipeline_mode<synchronous>, transform_indices = @transform_2, window_bounds = array<i64: 1, 64>}, {transform_indices = @transform_3, window_bounds = array<i64: 8, 64>}]} {
    %c0 = arith.constant 0 : index
    %c0_0 = arith.constant 0 : index
    %0 = vector.load %arg1[%c0, %c0_0] : memref<8x256xf32, #tpu.memory_space<vmem>>, vector<8x256xf32>
    %c0_1 = arith.constant 0 : index
    %c0_2 = arith.constant 0 : index
    %1 = vector.load %arg2[%c0_1, %c0_2] : memref<256x64xf32, #tpu.memory_space<vmem>>, vector<256x64xf32>
    %cst = arith.constant dense<0.000000e+00> : vector<8x64xf32>
    %2 = tpu.matmul %0, %1, %cst {dimension_numbers = #tpu.dot_dimension_numbers<[1], [0], [0], [1], [0, 0, 1, 1], [], []>} : vector<8x256xf32>, vector<256x64xf32>, vector<8x64xf32> -> vector<8x64xf32>
    %c0_3 = arith.constant 0 : index
    %c0_4 = arith.constant 0 : index
    %3 = vector.load %arg3[%c0_3, %c0_4] : memref<1x64xf32, #tpu.memory_space<vmem>>, vector<1x64xf32>
    %4 = vector.broadcast %3 : vector<1x64xf32> to vector<8x64xf32>
    %5 = arith.addf %2, %4 : vector<8x64xf32>
    %c0_5 = arith.constant 0 : index
    %c0_6 = arith.constant 0 : index
    %6 = vector.load %arg4[%c0_5, %c0_6] : memref<8x64xf32, #tpu.memory_space<vmem>>, vector<8x64xf32>
    tpu.vector_store %arg4[%c0_5, %c0_6], %5 {strides = array<i32>} : memref<8x64xf32, #tpu.memory_space<vmem>>, vector<8x64xf32>,
    return
  }
  func.func @transform_0(%arg0: i32) -> (i32, i32) {
    %c0_i32 = arith.constant 0 : i32
    %c0_i32_0 = arith.constant 0 : i32
    return %arg0, %c0_i32 : i32, i32
  }
  func.func @transform_1(%arg0: i32) -> (i32, i32) {
    %c0_i32 = arith.constant 0 : i32
    %c0_i32_0 = arith.constant 0 : i32
    %c0_i32_1 = arith.constant 0 : i32
    return %c0_i32, %c0_i32_0 : i32, i32
  }
  func.func @transform_2(%arg0: i32) -> (i32, i32) {
    %c0_i32 = arith.constant 0 : i32
    %c0_i32_0 = arith.constant 0 : i32
    %c0_i32_1 = arith.constant 0 : i32
    return %c0_i32, %c0_i32_0 : i32, i32
  }
  func.func @transform_3(%arg0: i32) -> (i32, i32) {
    %c0_i32 = arith.constant 0 : i32
    %c0_i32_0 = arith.constant 0 : i32
    return %arg0, %c0_i32 : i32, i32
  }
}

</mosaic_0001>

<bundles_post_ra>
// kernel: patch_embedding.1
= control target key start
LH: loop header
LB: loop body
LE: loop exit
PB: predicated region body
PF: predicated region fallthrough
CT: control target
= control target key end

     0   :  { %s373_s0 = inlined_call_operand.vmem [shape: f32[8,256], index: 0, kind: input, shape index: {}]   ;;  %s374_s1 = inlined_call_operand.vmem [shape: f32[256,64], index: 1, kind: input, shape index: {}]   ;;  %s375_s2 = inlined_call_operand.vmem [shape: f32[1,64], index: 2, kind: input, shape index: {}]   ;;  %s376_s3 = inlined_call_operand.hbm [shape: f32[8,64], index: 3, kind: output, shape index: {}]  }
   0x1   :  { %v33_v0 = vld [vmem:[%s374_s1 + $0x80] sm:$0xff]  ;;  %v34_v1 = vld [vmem:[%s374_s1 + $0x88] sm:$0xff]  ;;  %v35_v5 = vld [vmem:[%s374_s1 + $0x90] sm:$0xff] }
   0x2   :  { %v17_v2 = vld [vmem:[%s374_s1] sm:$0xff]  ;;  %v178_v3 = vpack.c.bf16 %v34_v1, %v33_v0  ;;  %v18_v4 = vld [vmem:[%s374_s1 + $0x8] sm:$0xff]  ;;  %v36_v6 = vld [vmem:[%s374_s1 + $0x98] sm:$0xff] }
   0x3   :  { %v180_v7 = vpack.c.bf16 %v18_v4, %v17_v2  ;;  %v182_v8 = vpack.c.bf16 %v36_v6, %v35_v5  ;;  %v19_v9 = vld [vmem:[%s374_s1 + $0x10] sm:$0xff]  ;;  %v20_v10 = vld [vmem:[%s374_s1 + $0x18] sm:$0xff]  ;;  %v37_v11 = vld [vmem:[%s374_s1 + $0xa0] sm:$0xff] }
   0x4   :  { %179 = vmatprep.subr.bf16.mxu0 %v178_v3  ;;  %v38_v12 = vld [vmem:[%s374_s1 + $0xa8] sm:$0xff]  ;;  %v184_v13 = vpack.c.bf16 %v20_v10, %v19_v9  ;;  %v21_v15 = vld [vmem:[%s374_s1 + $0x20] sm:$0xff]  ;;  %v39_v17 = vld [vmem:[%s374_s1 + $0xb0] sm:$0xff] }
   0x5   :  { %181 = vmatpush3.bf16.msra.mxu0 %v180_v7  ;;  %v186_v14 = vpack.c.bf16 %v38_v12, %v37_v11  ;;  %v22_v16 = vld [vmem:[%s374_s1 + $0x28] sm:$0xff]  ;;  %v40_v18 = vld [vmem:[%s374_s1 + $0xb8] sm:$0xff]  ;;  %v23_v21 = vld [vmem:[%s374_s1 + $0x30] sm:$0xff] }
   0x6   :  { %183 = vmatprep.subr.bf16.mxu0 %v182_v8  ;;  %v188_v19 = vpack.c.bf16 %v22_v16, %v21_v15  ;;  %v190_v20 = vpack.c.bf16 %v40_v18, %v39_v17  ;;  %v24_v22 = vld [vmem:[%s374_s1 + $0x38] sm:$0xff]  ;;  %v41_v23 = vld [vmem:[%s374_s1 + $0xc0] sm:$0xff]  ;;  %v42_v24 = vld [vmem:[%s374_s1 + $0xc8] sm:$0xff] }
   0x7   :  { %v16_v25 = vld [vmem:[%s373_s0 + $0x8] sm:$0xff] }
   0x8   :  { %120 = vmatprep.mubr.f32.mxu0 %v16_v25 }
   0x9   :  { %185 = vmatpush3.bf16.msra.mxu0 %v184_v13 }
   0xa   :  { %187 = vmatprep.subr.bf16.mxu0 %v186_v14 }
   0xb   :  { %8 = vsyncpa [#allocation3], 0  ;;  %v192_v26 = vpack.c.bf16 %v24_v22, %v23_v21  ;;  %v194_v27 = vpack.c.bf16 %v42_v24, %v41_v23  ;;  %v25_v28 = vld [vmem:[%s374_s1 + $0x40] sm:$0xff]  ;;  %v26_v29 = vld [vmem:[%s374_s1 + $0x48] sm:$0xff]  ;;  %s235_s28 = smov [#allocation2]   ;;  %vm126_vm0 = vcmask 523264  }
   0xc   :  { %v43_v30 = vld [vmem:[%s374_s1 + $0xd0] sm:$0xff]  ;;  %v44_v31 = vld [vmem:[%s374_s1 + $0xd8] sm:$0xff]  ;;  %v196_v32 = vpack.c.bf16 %v26_v29, %v25_v28  ;;  %v45_v36 = vld [vmem:[%s374_s1 + $0xe0] sm:$0xff]  ;;  %s134_s29 = sshll.u32 %s235_s28, 4  ;;  %s135_s29 = int_to_ptr.vmem [resolvable:$true] %s134_s29 }
   0xd   :  { %189 = vmatpush3.bf16.msra.mxu0 %v188_v19  ;;  %v198_v33 = vpack.c.bf16 %v44_v31, %v43_v30  ;;  %v27_v34 = vld [vmem:[%s374_s1 + $0x50] sm:$0xff]  ;;  %v28_v35 = vld [vmem:[%s374_s1 + $0x58] sm:$0xff]  ;;  %v46_v37 = vld [vmem:[%s374_s1 + $0xe8] sm:$0xff]  ;;  %p216_p1 = scmp.lt.s32.totalorder %s135_s29, %s135_s29 }
   0xe   :  { %191 = vmatprep.subr.bf16.mxu0 %v190_v20  ;;  %v200_v38 = vpack.c.bf16 %v28_v35, %v27_v34  ;;  %v202_v39 = vpack.c.bf16 %v46_v37, %v45_v36  ;;  %v29_v40 = vld [vmem:[%s374_s1 + $0x60] sm:$0xff]  ;;  %v30_v41 = vld [vmem:[%s374_s1 + $0x68] sm:$0xff]  ;;  %v47_v42 = vld [vmem:[%s374_s1 + $0xf0] sm:$0xff] }
   0xf   :  { %v48_v43 = vld [vmem:[%s374_s1 + $0xf8] sm:$0xff]  ;;  %v204_v44 = vpack.c.bf16 %v30_v41, %v29_v40  ;;  %v31_v46 = vld [vmem:[%s374_s1 + $0x70] sm:$0xff]  ;;  %v15_v49 = vld [vmem:[%s373_s0] sm:$0xff] }
  0x10   :  { %v206_v45 = vpack.c.bf16 %v48_v43, %v47_v42  ;;  %v32_v47 = vld [vmem:[%s374_s1 + $0x78] sm:$0xff]  ;;  %v142_v51 = vld [vmem:[%s375_s2] ss:$0 sm:$0xff]  ;;  %s211_s1 = scalar_lea.vmem %s135_s29, 128 }
  0x11   :  { %193 = vmatpush3.bf16.msra.mxu0 %v192_v26  ;;  %v208_v48 = vpack.c.bf16 %v32_v47, %v31_v46  ;;  %p212_p0 = scmp.ne.s32.totalorder %s135_s29, %s211_s1  ;;  %p217_p2 = scmp.lt.s32.totalorder %s211_s1, %s211_s1 }
  0x12   :  { %195 = vmatprep.subr.bf16.mxu0 %v194_v27 }
  0x13   :  { %p218_p3 = por %p217_p2, %p216_p1 }
  0x15   :  { %197 = vmatpush3.bf16.msra.mxu0 %v196_v32  ;;  %p219_p4 = pnand %p218_p3, %p212_p0 }
  0x16   :  { %199 = vmatprep.subr.bf16.mxu0 %v198_v33 }
  0x19   :  { %201 = vmatpush3.bf16.msra.mxu0 %v200_v38 }
  0x1a   :  { %203 = vmatprep.subr.bf16.mxu0 %v202_v39 }
  0x1d   :  { %205 = vmatpush3.bf16.msra.mxu0 %v204_v44 }
  0x1e   :  { %207 = vmatprep.subr.bf16.mxu0 %v206_v45 }
  0x21   :  { %209 = vmatpush3.bf16.msra.mxu0 %v208_v48 }
  0x24   :  { %121 = vmatmul.mubr.f32.vlgmr.msra.gmra.mrb[0].mxu0 %v15_v49 }
  0xf7   :  { %v175_v50 = vpop.f32.mrb[0].mxu0 }
  0xf8   :  { %v176_v52 = vpop.f32.mrb[1].mxu0 }
  0xf9   :  { %v177_v53 = vadd.f32 %v176_v52, %v175_v50 }
  0xfb   :  { %v123_v54 = vadd.f32 %v177_v53, %v142_v51 }
  0xfd   :  { %127 = vst.msk [vmem:[#allocation2] sm:$0xff] %vm126_vm0, %v123_v54 }
  0xfe   :  { %222 = shalt.err (!%p219_p4)
}
  0xff   :  { %s223_s4 = scalar_lea.hbm %s376_s3, 128 }
 0x100   :  { %p224_p5 = scmp.ne.s32.totalorder %s376_s3, %s223_s4  ;;  %p227_p6 = scmp.lt.u32.totalorder %s223_s4, %s376_s3 }
 0x102   :  { %p229_p7 = pnand %p227_p6, %p224_p5 }
 0x104   :  { %232 = shalt.err (!%p229_p7)
}
 0x105   :  { %137 = dma.vmem_to_hbm [thread:$0]  %s135_s29, 128, %s376_s3, [#allocation3]  }
 0x106   :  { %233 = dma.done.wait [#allocation3], 128  }
 0x107   :  { %234 = vsyncadd [#allocation3], 4294967168 }
 0x108   :  { %141 = vsyncpa [#allocation3], 1 }

</bundles_post_ra>
